<compile_context>
chip_gen: v5e
topology: v5e:2x2
jax: 0.10.0
libtpu: 0.0.40
codegen_flags: <defaults>
</compile_context>

<pallas_src>
import functools

import jax
import jax.numpy as jnp
from jax.experimental import pallas as pl
from jax.experimental.pallas import tpu as pltpu


def _round_up(x, m):
    return (x + m - 1) // m * m


def _vmem_budget_bytes():
    """Generation-aware scoped-VMEM limit (v7x has 64 MiB, v5e/v6e 128 MiB)."""
    cap = 64 * 1024 * 1024
    try:
        info = pltpu.get_tpu_info()
        cap = int(getattr(info, "vmem_capacity_bytes", cap))
    except Exception:
        pass
    if cap >= 96 * 1024 * 1024:
        return 80 * 1024 * 1024, True
    return 40 * 1024 * 1024, False


# --------------------------------------------------------------------------
# Kernel 1a: single-shot matmul (whole K resident) + per-tile BN stat partials
# --------------------------------------------------------------------------
def _conv_matmul_stats_single_kernel(p_ref, w_ref, y_ref, s_ref, ss_ref):
    # grid = (i: row tiles [parallel], j: cout tiles [parallel])
    acc = jnp.dot(p_ref[...], w_ref[...], preferred_element_type=jnp.float32)
    y_ref[...] = acc.astype(y_ref.dtype)
    # Per-row-tile partial sums (reduced outside) -> row axis stays race-free
    # when marked "parallel" (megacore sharding on v7x).
    s_ref[...] = jnp.sum(acc, axis=0).reshape(1, 1, -1)
    ss_ref[...] = jnp.sum(acc * acc, axis=0).reshape(1, 1, -1)


# --------------------------------------------------------------------------
# Kernel 1b: k-tiled matmul + per-tile BN stat partials (large K)
# --------------------------------------------------------------------------
def _conv_matmul_stats_kernel(p_ref, w_ref, y_ref, s_ref, ss_ref, acc_ref, *,
                              tk, resident_w):
    # grid = (i: row tiles [parallel], j: cout tiles [parallel],
    #         k: reduction tiles [arbitrary])
    k = pl.program_id(2)
    nk = pl.num_programs(2)

    @pl.when(k == 0)
    def _():
        acc_ref[...] = jnp.zeros_like(acc_ref)

    if resident_w:
        # Weight slab (Kp, tn) stays in VMEM across i and k; slice the current
        # reduction tile out of it.
        k_off = pl.multiple_of(k * tk, tk)
        w = w_ref[pl.ds(k_off, tk), :]
    else:
        w = w_ref[...]
    acc_ref[...] += jnp.dot(p_ref[...], w, preferred_element_type=jnp.float32)

    @pl.when(k == nk - 1)
    def _():
        acc = acc_ref[...]
        y_ref[...] = acc.astype(y_ref.dtype)
        s_ref[...] = jnp.sum(acc, axis=0).reshape(1, 1, -1)
        ss_ref[...] = jnp.sum(acc * acc, axis=0).reshape(1, 1, -1)


# --------------------------------------------------------------------------
# Kernel 2: fused per-channel affine (folded BN) + ReLU + layout transpose.
# Reads bf16 (tm, Cp), writes f32 (1, Cp, tm) so the wrapper needs no big
# NCDHW transpose afterwards (XLU transpose is free filler here).
# --------------------------------------------------------------------------
def _bn_act_transpose_kernel(y_ref, scale_ref, shift_ref, o_ref, *, apply_relu):
    o = y_ref[...].astype(jnp.float32) * scale_ref[...] + shift_ref[...]
    if apply_relu:
        o = jnp.maximum(o, 0.0)
    o_ref[...] = jnp.transpose(o).astype(o_ref.dtype)[None]


# --------------------------------------------------------------------------
# Unit3D wrapper
# --------------------------------------------------------------------------
class Unit3D:
    def __init__(self, in_channels, output_channels, kernel_shape=(1, 1, 1),
                 stride=(1, 1, 1), padding=0, activation_fn="relu",
                 use_batch_norm=True, use_bias=False,
                 key=jax.random.PRNGKey(0), eps=1e-5):
        self.in_channels = in_channels
        self.out_channels = output_channels
        self.kernel_shape = tuple(kernel_shape)
        self.stride = tuple(stride)
        self.padding = ((padding,) * 3 if isinstance(padding, int)
                        else tuple(padding))
        self.activation_fn = activation_fn
        self.use_batch_norm = use_batch_norm
        self.use_bias = use_bias
        self.eps = eps

        kd, kh, kw = self.kernel_shape
        fan_in = in_channels * kd * kh * kw
        bound = 1.0 / (fan_in ** 0.5)
        k_w, k_b = jax.random.split(key, 2)
        # Conv3d weight: (Cout, Cin, kd, kh, kw) -- deterministic synthetic init.
        self.weight = jax.random.uniform(
            k_w, (output_channels, in_channels, kd, kh, kw),
            jnp.float32, -bound, bound)
        self.bias = (jax.random.uniform(k_b, (output_channels,),
                                        jnp.float32, -bound, bound)
                     if use_bias else None)
        # BatchNorm3d affine params (PyTorch default init).
        self.gamma = jnp.ones((output_channels,), jnp.float32)
        self.beta = jnp.zeros((output_channels,), jnp.float32)

    def __call__(self, x):
        # x: (N, Cin, D, H, W) float32  -> returns (N, Cout, Do, Ho, Wo) float32
        N, Cin, D, H, W = x.shape
        kd, kh, kw = self.kernel_shape
        sd, sh, sw = self.stride
        pd, ph, pw = self.padding
        Do = (D + 2 * pd - kd) // sd + 1
        Ho = (H + 2 * ph - kh) // sh + 1
        Wo = (W + 2 * pw - kw) // sw + 1
        Cout = self.out_channels
        M_per = Do * Ho * Wo            # rows per sample
        K = Cin * kd * kh * kw

        vmem_limit, big_vmem = _vmem_budget_bytes()

        # ---- channels-last im2col glue (plain JAX, bf16). The NDHWC transpose
        #      runs on the un-inflated input; the tap stack is already in
        #      (Cin major, tap minor) order so no transpose of the 27x array. ----
        xl = jnp.transpose(x, (0, 2, 3, 4, 1)).astype(jnp.bfloat16)  # NDHWC
        xp = jnp.pad(xl, ((0, 0), (pd, pd), (ph, ph), (pw, pw), (0, 0)))
        cols = []
        for a in range(kd):
            for b in range(kh):
                for c in range(kw):
                    cols.append(xp[:,
                                   a:a + Do * sd:sd,
                                   b:b + Ho * sh:sh,
                                   c:c + Wo * sw:sw, :])
        # (N, Do, Ho, Wo, Cin, taps) -> (N, M_per, K); K ordering matches
        # weight.reshape(Cout, -1) = (Cin, kd, kh, kw).
        patches = jnp.stack(cols, axis=-1).reshape(N, M_per, K)
        w2 = self.weight.reshape(Cout, -1).T.astype(jnp.bfloat16)    # (K, Cout)

        # ---- tile selection (generation-aware) ----
        tm = min(512, _round_up(M_per, 128))
        tk = min(512, _round_up(K, 128))
        tn_cap = 1024 if (big_vmem and Cout > 512) else 512
        tn = min(tn_cap, _round_up(Cout, 128))

        Mp_per = _round_up(M_per, tm)          # per-sample row padding
        Kp = _round_up(K, tk)
        Cp = _round_up(Cout, tn)
        rpn = Mp_per // tm                     # row tiles per sample
        n_row_tiles = N * rpn

        p_pad = jnp.pad(patches, ((0, 0), (0, Mp_per - M_per), (0, Kp - K)))
        p_pad = p_pad.reshape(N * Mp_per, Kp)
        w_pad = jnp.pad(w2, ((0, Kp - K), (0, Cp - Cout)))

        nk = Kp // tk
        stats_shape = jax.ShapeDtypeStruct((n_row_tiles, 1, Cp), jnp.float32)

        if nk == 1:
            # Collapsed reduction: single dot, no accumulator scratch.
            grid = (n_row_tiles, Cp // tn)
            in_specs = [pl.BlockSpec((tm, Kp), lambda i, j: (i, 0)),
                        pl.BlockSpec((Kp, tn), lambda i, j: (0, j))]
            out_specs = [pl.BlockSpec((tm, tn), lambda i, j: (i, j)),
                         pl.BlockSpec((1, 1, tn), lambda i, j: (i, 0, j)),
                         pl.BlockSpec((1, 1, tn), lambda i, j: (i, 0, j))]
            scratch = []
            kern = _conv_matmul_stats_single_kernel
            dims = ("parallel", "parallel")
        else:
            grid = (n_row_tiles, Cp // tn, nk)
            slab_bytes = Kp * tn * 2           # bf16 resident weight slab
            if slab_bytes <= 8 * 1024 * 1024:
                w_spec = pl.BlockSpec((Kp, tn), lambda i, j, k: (0, j))
                resident = True
            elif slab_bytes <= 20 * 1024 * 1024:
                # Single-buffered resident slab: halves the footprint; at most
                # one stall per j change (its index only depends on j).
                w_spec = pl.BlockSpec((Kp, tn), lambda i, j, k: (0, j),
                                      pipeline_mode=pl.Buffered(1))
                resident = True
            else:
                # Too big to keep resident (v7x 64 MiB guard): stream (tk, tn).
                w_spec = pl.BlockSpec((tk, tn), lambda i, j, k: (k, j))
                resident = False
            in_specs = [pl.BlockSpec((tm, tk), lambda i, j, k: (i, k)), w_spec]
            out_specs = [pl.BlockSpec((tm, tn), lambda i, j, k: (i, j)),
                         pl.BlockSpec((1, 1, tn), lambda i, j, k: (i, 0, j)),
                         pl.BlockSpec((1, 1, tn), lambda i, j, k: (i, 0, j))]
            scratch = [pltpu.VMEM((tm, tn), jnp.float32)]
            kern = functools.partial(_conv_matmul_stats_kernel,
                                     tk=tk, resident_w=resident)
            dims = ("parallel", "parallel", "arbitrary")

        # ---- Kernel 1: conv matmul + per-channel batch-stat partials ----
        # NOTE: stats are tiny (n_row_tiles x Cp) and always emitted; when
        # use_batch_norm=False they are simply ignored (negligible traffic).
        y, s, ss = pl.pallas_call(
            kern,
            out_shape=(jax.ShapeDtypeStruct((N * Mp_per, Cp), jnp.bfloat16),
                       stats_shape, stats_shape),
            grid_spec=pltpu.PrefetchScalarGridSpec(
                num_scalar_prefetch=0,
                grid=grid,
                in_specs=in_specs,
                out_specs=out_specs,
                scratch_shapes=scratch),
            compiler_params=pltpu.CompilerParams(
                dimension_semantics=dims,
                vmem_limit_bytes=vmem_limit),
        )(p_pad, w_pad)

        # ---- fold BatchNorm (training-mode batch stats) into scale/shift ----
        if self.use_batch_norm:
            # Padded rows are all-zero patches -> contribute 0 to the sums.
            count = float(N * M_per)
            s_tot = jnp.sum(s[:, 0, :Cout], axis=0)
            ss_tot = jnp.sum(ss[:, 0, :Cout], axis=0)
            mean = s_tot / count
            # One-pass variance; clamp at 0 to guard against cancellation.
            # TODO(synk): per-tile centered sums would be more robust for very
            #             large M / large |mean|/std ratios.
            var = jnp.maximum(ss_tot / count - mean * mean, 0.0)
            scale = self.gamma / jnp.sqrt(var + self.eps)
            # Conv bias is a per-channel constant and is exactly cancelled by
            # the batch-mean subtraction of training-mode BN.
            shift = self.beta - mean * scale
        else:
            scale = jnp.ones((Cout,), jnp.float32)
            shift = (self.bias if self.bias is not None
                     else jnp.zeros((Cout,), jnp.float32))

        scale_p = jnp.pad(scale, (0, Cp - Cout)).reshape(1, Cp)
        shift_p = jnp.pad(shift, (0, Cp - Cout)).reshape(1, Cp)

        # ---- Kernel 2: fused affine + ReLU + in-kernel transpose ----
        # Output laid out as (N, Cp, Mp_per) so the final NCDHW result is a
        # cheap slice + reshape (no full-tensor XLA transpose).
        o = pl.pallas_call(
            functools.partial(_bn_act_transpose_kernel,
                              apply_relu=self.activation_fn is not None),
            out_shape=jax.ShapeDtypeStruct((N, Cp, Mp_per), jnp.float32),
            grid_spec=pltpu.PrefetchScalarGridSpec(
                num_scalar_prefetch=0,
                grid=(n_row_tiles,),
                in_specs=[pl.BlockSpec((tm, Cp), lambda r: (r, 0)),
                          pl.BlockSpec((1, Cp), lambda r: (0, 0)),
                          pl.BlockSpec((1, Cp), lambda r: (0, 0))],
                out_specs=pl.BlockSpec((1, Cp, tm),
                                       lambda r: (r // rpn, 0, r % rpn))),
            compiler_params=pltpu.CompilerParams(
                dimension_semantics=("parallel",),
                vmem_limit_bytes=vmem_limit),
        )(y, scale_p, shift_p)

        out = o[:, :Cout, :M_per].reshape(N, Cout, Do, Ho, Wo)
        return out


# --------------------------------------------------------------------------
# Pure-JAX reference for sanity checking
# --------------------------------------------------------------------------
def _reference(unit, x):
    conv = jax.lax.conv_general_dilated(
        x, unit.weight,
        window_strides=unit.stride,
        padding=[(p, p) for p in unit.padding],
        dimension_numbers=("NCDHW", "OIDHW", "NCDHW"),
        precision=jax.lax.Precision.HIGHEST)
    if unit.bias is not None:
        conv = conv + unit.bias.reshape(1, -1, 1, 1, 1)
    y = conv
    if unit.use_batch_norm:
        mean = conv.mean(axis=(0, 2, 3, 4), keepdims=True)
        var = conv.var(axis=(0, 2, 3, 4), keepdims=True)
        y = (unit.gamma.reshape(1, -1, 1, 1, 1) * (conv - mean)
             / jnp.sqrt(var + unit.eps)
             + unit.beta.reshape(1, -1, 1, 1, 1))
    if unit.activation_fn is not None:
        y = jnp.maximum(y, 0.0)
    return y


if __name__ == "__main__":
    key = jax.random.PRNGKey(0)
    k_x, k_p = jax.random.split(key)

    # Small shapes consistent with a Unit3D block: N=2, Cin=4, D=H=W=8.
    N, Cin, D, H, W = 2, 4, 8, 8, 8
    Cout = 8
    x = jax.random.normal(k_x, (N, Cin, D, H, W), jnp.float32)

    unit = Unit3D(in_channels=Cin, output_channels=Cout,
                  kernel_shape=(3, 3, 3), stride=(1, 1, 1), padding=1,
                  use_batch_norm=True, use_bias=False, key=k_p)

    out = unit(x)
    out = jax.block_until_ready(out)

    assert out.shape == (N, Cout, D, H, W), out.shape

    ref = jax.block_until_ready(_reference(unit, x))
    err = float(jnp.max(jnp.abs(out - ref)))
    if err > 5e-2:
        raise AssertionError(f"mismatch vs reference, max abs err = {err}")

    print("KERNEL_OK")
</pallas_src>

<mosaic_0001>
module attributes {stable_mosaic.version = 11 : i64} {
  func.func @_conv_matmul_stats_single_kernel(%arg0: i32, %arg1: i32, %arg2: memref<512x128xbf16, #tpu.memory_space<vmem>>, %arg3: memref<128x128xbf16, #tpu.memory_space<vmem>>, %arg4: memref<512x128xbf16, #tpu.memory_space<vmem>>, %arg5: memref<1x1x128xf32, #tpu.memory_space<vmem>>, %arg6: memref<1x1x128xf32, #tpu.memory_space<vmem>>) attributes {dimension_semantics = [#tpu.dimension_semantics<parallel>, #tpu.dimension_semantics<parallel>], iteration_bounds = array<i64: 2, 1>, scalar_prefetch = 0 : i64, scratch_operands = 0 : i64, tpu.core_type = #tpu.core_type<tc>, window_params = [{transform_indices = @transform_0, window_bounds = array<i64: 512, 128>}, {transform_indices = @transform_1, window_bounds = array<i64: 128, 128>}, {transform_indices = @transform_2, window_bounds = array<i64: 512, 128>}, {transform_indices = @transform_3, window_bounds = array<i64: 1, 1, 128>}, {transform_indices = @transform_4, window_bounds = array<i64: 1, 1, 128>}]} {
    %c0 = arith.constant 0 : index
    %c0_0 = arith.constant 0 : index
    %0 = vector.load %arg2[%c0, %c0_0] : memref<512x128xbf16, #tpu.memory_space<vmem>>, vector<512x128xbf16>
    %c0_1 = arith.constant 0 : index
    %c0_2 = arith.constant 0 : index
    %1 = vector.load %arg3[%c0_1, %c0_2] : memref<128x128xbf16, #tpu.memory_space<vmem>>, vector<128x128xbf16>
    %cst = arith.constant dense<0.000000e+00> : vector<512x128xf32>
    %2 = tpu.matmul %0, %1, %cst {dimension_numbers = #tpu.dot_dimension_numbers<[1], [0], [0], [1], [0, 0, 1, 1], [], []>} : vector<512x128xbf16>, vector<128x128xbf16>, vector<512x128xf32> -> vector<512x128xf32>
    %3 = arith.truncf %2 : vector<512x128xf32> to vector<512x128xbf16>
    %c0_3 = arith.constant 0 : index
    %c0_4 = arith.constant 0 : index
    %4 = vector.load %arg4[%c0_3, %c0_4] : memref<512x128xbf16, #tpu.memory_space<vmem>>, vector<512x128xbf16>
    tpu.vector_store %arg4[%c0_3, %c0_4], %3 {strides = array<i32>} : memref<512x128xbf16, #tpu.memory_space<vmem>>, vector<512x128xbf16>,
    %cst_5 = arith.constant dense<0.000000e+00> : vector<128xf32>
    %5 = vector.multi_reduction <add>, %2, %cst_5 [0] : vector<512x128xf32> to vector<128xf32>
    %6 = vector.shape_cast %5 : vector<128xf32> to vector<1x1x128xf32>
    %c0_6 = arith.constant 0 : index
    %c0_7 = arith.constant 0 : index
    %c0_8 = arith.constant 0 : index
    %7 = vector.load %arg5[%c0_6, %c0_7, %c0_8] : memref<1x1x128xf32, #tpu.memory_space<vmem>>, vector<1x1x128xf32>
    tpu.vector_store %arg5[%c0_6, %c0_7, %c0_8], %6 {strides = array<i32>} : memref<1x1x128xf32, #tpu.memory_space<vmem>>, vector<1x1x128xf32>,
    %8 = arith.mulf %2, %2 : vector<512x128xf32>
    %cst_9 = arith.constant dense<0.000000e+00> : vector<128xf32>
    %9 = vector.multi_reduction <add>, %8, %cst_9 [0] : vector<512x128xf32> to vector<128xf32>
    %10 = vector.shape_cast %9 : vector<128xf32> to vector<1x1x128xf32>
    %c0_10 = arith.constant 0 : index
    %c0_11 = arith.constant 0 : index
    %c0_12 = arith.constant 0 : index
    %11 = vector.load %arg6[%c0_10, %c0_11, %c0_12] : memref<1x1x128xf32, #tpu.memory_space<vmem>>, vector<1x1x128xf32>
    tpu.vector_store %arg6[%c0_10, %c0_11, %c0_12], %10 {strides = array<i32>} : memref<1x1x128xf32, #tpu.memory_space<vmem>>, vector<1x1x128xf32>,
    return
  }
  func.func @transform_0(%arg0: i32, %arg1: i32) -> (i32, i32) {
    %c0_i32 = arith.constant 0 : i32
    %c0_i32_0 = arith.constant 0 : i32
    return %arg0, %c0_i32 : i32, i32
  }
  func.func @transform_1(%arg0: i32, %arg1: i32) -> (i32, i32) {
    %c0_i32 = arith.constant 0 : i32
    %c0_i32_0 = arith.constant 0 : i32
    return %c0_i32, %arg1 : i32, i32
  }
  func.func @transform_2(%arg0: i32, %arg1: i32) -> (i32, i32) {
    %c0_i32 = arith.constant 0 : i32
    return %arg0, %arg1 : i32, i32
  }
  func.func @transform_3(%arg0: i32, %arg1: i32) -> (i32, i32, i32) {
    %c0_i32 = arith.constant 0 : i32
    %c0_i32_0 = arith.constant 0 : i32
    return %arg0, %c0_i32, %arg1 : i32, i32, i32
  }
  func.func @transform_4(%arg0: i32, %arg1: i32) -> (i32, i32, i32) {
    %c0_i32 = arith.constant 0 : i32
    %c0_i32_0 = arith.constant 0 : i32
    return %arg0, %c0_i32, %arg1 : i32, i32, i32
  }
}

</mosaic_0001>

<bundles_post_ra>
// kernel: tpu_custom_call.1
= control target key start
LH: loop header
LB: loop body
LE: loop exit
PB: predicated region body
PF: predicated region fallthrough
CT: control target
= control target key end

     0   :  { %s2635_s0 = inlined_call_operand.hbm [shape: bf16[1024,128], index: 0, kind: input, shape index: {}]   ;;  %s2636_s1 = inlined_call_operand.hbm [shape: bf16[128,128], index: 1, kind: input, shape index: {}]   ;;  %s2637_s2 = inlined_call_operand.hbm [shape: bf16[1024,128], index: 2, kind: output, shape index: {0}]   ;;  %s2638_s3 = inlined_call_operand.hbm [shape: f32[2,1,128], index: 3, kind: output, shape index: {1}]   ;;  %s2639_s4 = inlined_call_operand.hbm [shape: f32[2,1,128], index: 4, kind: output, shape index: {2}]  }
   0x1   :  { %2644 = sst [smem:[#allocation16_spill]] %s2636_s1 }
   0x2   :  { %10 = vsyncpa [#allocation3], 0 }
   0x3   :  { %12 = vsyncpa [#allocation3 + $0x1], 0 }
   0x4   :  { %13 = vsyncpa [#allocation6], 0 }
   0x5   :  { %14 = vsyncpa [#allocation4], 0 }
   0x6   :  { %16 = vsyncpa [#allocation4 + $0x1], 0 }
   0x7   :  { %17 = vsyncpa [#allocation9], 0 }
   0x8   :  { %19 = vsyncpa [#allocation9 + $0x1], 0  ;;  %s2061_s15 = smov 0   ;;  %s2063_s16 = smov 0  }
   0x9   :  { %s2065_s17 = smov 0   ;;  %s2067_s18 = smov 0  }
   0xa   :  { %s2069_s19 = smov 0   ;;  %s2071_s20 = smov 0  }
   0xb LB: > { %s2092_s21 = sadd.s32 4294967295, %s2029_s20   ;;  %s2640_s22 = sadd.s32 4294967294, %s2029_s20   ;;  %s2029_s20 = sphi %s2071_s20, %s25_s20   ;;  %s2025_s19 = sphi %s2069_s19, %s2660_s19   ;;  %s2021_s18 = sphi %s2067_s18, %s2659_s18   ;;  %s2017_s17 = sphi %s2065_s17, %s2658_s17   ;;  %s2013_s16 = sphi %s2063_s16, %s2657_s16   ;;  %s2009_s15 = sphi %s2061_s15, %s2656_s15  }
   0xc   : > { %p57_p0 = scmp.ne.s32.totalorder %s2013_s16, %s2009_s15  ;;  %p58_p1 = scmp.eq.s32.totalorder %s2092_s21, 0 }
   0xd   : > { %p109_p2 = scmp.eq.s32.totalorder %s2092_s21, 1  ;;  %p115_p3 = scmp.eq.s32.totalorder %s2640_s22, 1 }
   0xe   : > { %p2103_p4 = por %p58_p1, %p57_p0  ;;  %p1304_p5 = scmp.ge.s32.totalorder %s2029_s20, 1 }
   0xf   : > { %p2108_p6 = por %p115_p3, %p57_p0  ;;  %p178_p7 = scmp.lt.s32.totalorder %s2029_s20, 3 }
  0x10   : > { %s2647_s1 = sld [smem:[#allocation16_spill]]  ;;  %s2031_s29 = smov [#allocation5]  }
  0x11   : > { %p2116_p8 = pnand %p1304_p5, %p178_p7  ;;  %s193_s30 = sshll.u32 %s2031_s29, 4  ;;  %s194_s30 = int_to_ptr.vmem [resolvable:$true] %s193_s30 }
  0x12   : > { %p1306_p11 = scmp.ge.s32.totalorder %s2029_s20, 2  ;;  %s2641_s5 = smov 64  }
  0x13   : > { %p1748_p9 = pneg %p2116_p8  ;;  %s2642_s6 = smov 4  }
  0x14   : > { %s37_s7 = sadd.s32 1, %s2025_s19  ;;  %s44_s8 = sadd.s32 1, %s2017_s17 }
  0x15   : > { %p1749_p10 = pnand %p1748_p9, %p58_p1  ;;  %p39_p12 = scmp.ge.s32.totalorder %s37_s7, 2 }
  0x16   : > { %s191_s27 = sshll.u32 %s2647_s1, 4  ;;  %p51_p13 = scmp.ne.s32.totalorder %s2017_s17, %s2013_s16  ;;  %s192_s27 = int_to_ptr.hbm [resolvable:$true] %s191_s27 }
  0x17   : > { %1751 = dma.hbm_to_vmem [thread:$0]  (!%p1749_p10), %s192_s27, 1024, %s194_s30, [#allocation6], %s2641_s5, %s2641_s5, %s2642_s6  }
  0x18   : > { %p52_p0 = scmp.eq.s32.totalorder %s2029_s20, 0  ;;  %s2662_s7 = smov (%p39_p12, %s37_s7), 0 }
  0x19   : > { %2649 = sst [smem:[#allocation15_spill]] %s2662_s7  ;;  %p2141_p5 = por %p109_p2, %p51_p13 }
  0x1a   : > { %p2135_p3 = por %p52_p0, %p51_p13  ;;  %s41_s11 = ssub.s32 %s2025_s19, %s2662_s7 }
  0x1b   : > { %p1767_p7 = scmp.lt.s32.totalorder %s2029_s20, 2  ;;  %p42_p9 = scmp.eq.s32.totalorder %s41_s11, 0 }
  0x1c   : > { %s207_s12 = sand.u32 1, %s2017_s17   ;;  %s1479_s25 = sshll.u32 %s2025_s19, 8 }
  0x1d   : > { %s1307_s13 = sshll.u32 %s207_s12, 8  ;;  %s216_s29 = scalar_lea.hbm %s2635_s0, %s1479_s25 }
  0x1e   : > { %s2150_s14 = scalar_select %p42_p9, %s2017_s17, %s44_s8  }
  0x1f   : > { %s211_s30 = scalar_lea.vmem [#allocation2], %s1307_s13  ;;  %s217_s5 = sshll.u32 %s216_s29, 4  ;;  %s218_s5 = int_to_ptr.hbm [resolvable:$true] %s217_s5 }
  0x20   : > { %s219_s22 = sshll.u32 %s211_s30, 4  ;;  %p1753_p2 = pnand %p1767_p7, %p2135_p3  ;;  %s220_s22 = int_to_ptr.vmem [resolvable:$true] %s219_s22 }
  0x21   : > { %s208_s6 = scalar_lea.sflag [#allocation3], %s207_s12  ;;  %s2652_s1 = smov 4  }
  0x22   : > { %s2653_s7 = smov 64   ;;  %231 = sbr.rel (%p2116_p8) target bundleno = 445 (0x1bd), region = 28 }
  0x23   : > { %1755 = dma.hbm_to_vmem [thread:$0]  (!%p1753_p2), %s218_s5, 4096, %s220_s22, %s208_s6, %s2653_s7, %s2653_s7, %s2652_s1  }
  0x24   : > { %s2164_s8 = sand.u32 (!%p2116_p8), 1, %s2013_s16  }
  0x25   : > { %s1311_s11 = sshll.u32 (!%p2116_p8), %s2164_s8, 8  ;;  %s234_s13 = scalar_lea.sflag (!%p2116_p8), [#allocation3], %s2164_s8 }
  0x26   : > { %s2170_s9 = scalar_lea.vmem (!%p2116_p8), [#allocation2], %s1311_s11 }
  0x27   : > { %1992 = dma.done.wait (%p2103_p4), %s234_s13, 4096  }
  0x28   : > { %1994 = vsyncadd (%p2103_p4), %s234_s13, 4294963200 }
  0x29   : > { %1996 = dma.done.wait (%p58_p1), [#allocation6], 1024  }
  0x2a   : > { %1998 = vsyncadd (%p58_p1), [#allocation6], 4294966272  ;;  %v1519_v0 = vld [vmem:[#allocation5 + $0x38] sm:$0xff]  ;;  %v1518_v1 = vld [vmem:[#allocation5 + $0x30] sm:$0xff]  ;;  %s2218_s1 = scalar_lea.vmem [#allocation7], %s1311_s11  ;;  %s1520_s22 = sshll.u32 %s2021_s18, 8 }
  0x2b   : > { %598 = vmatpush.bf16.msra.mxu0 %v1519_v0  ;;  %1712 = vmatpush.bf16.msra.mxu1 %v1519_v0  ;;  %v1517_v2 = vld [vmem:[#allocation5 + $0x28] sm:$0xff]  ;;  %v1516_v3 = vld [vmem:[#allocation5 + $0x20] sm:$0xff]  ;;  %v1515_v4 = vld [vmem:[#allocation5 + $0x18] sm:$0xff]  ;;  %s1120_s5 = scalar_lea.hbm %s2637_s2, %s1520_s22  ;;  %s1121_s6 = sshll.u32 %s2218_s1, 4  ;;  %s2484_s6 = int_to_ptr.vmem [resolvable:$true] %s1121_s6 }
  0x2c   : > { %1713 = vmatpush.bf16.msra.mxu2 %v1519_v0  ;;  %1714 = vmatpush.bf16.msra.mxu3 %v1519_v0  ;;  %v1514_v5 = vld [vmem:[#allocation5 + $0x10] sm:$0xff]  ;;  %v1513_v6 = vld [vmem:[#allocation5 + $0x8] sm:$0xff]  ;;  %v1512_v7 = vld [vmem:[#allocation5] sm:$0xff]  ;;  %s1123_s7 = sshll.u32 %s1120_s5, 4  ;;  %s1100_s12 = scalar_lea.sflag [#allocation4], %s2164_s8  ;;  %s1124_s7 = int_to_ptr.hbm [resolvable:$true] %s1123_s7 }
  0x2d   : > { %v1480_v8 = vld [vmem:[%s2170_s9] sm:$0xff]  ;;  %v1481_v10 = vld [vmem:[%s2170_s9 + $0x8] sm:$0xff]  ;;  %v1482_v13 = vld [vmem:[%s2170_s9 + $0x10] sm:$0xff]  ;;  %s1897_s25 = sshra.s32 %s1124_s7, 4  ;;  %s1903_s30 = scalar_lea.hbm %s2637_s2, 512  ;;  %s1898_s25 = int_to_ptr.hbm [resolvable:$true] %s1897_s25 }
  0x2e   : > { %v1488_v9 = vld [vmem:[%s2170_s9 + $0x40] sm:$0xff]  ;;  %v1489_v11 = vld [vmem:[%s2170_s9 + $0x48] sm:$0xff]  ;;  %v1490_v14 = vld [vmem:[%s2170_s9 + $0x50] sm:$0xff]  ;;  %s1899_s26 = scalar_lea.hbm %s1898_s25, 256  ;;  %p1904_p10 = scmp.lt.s32.totalorder %s1898_s25, %s2637_s2 }
  0x2f   : > { %599 = vmatpush.bf16.msra.mxu0 %v1518_v1  ;;  %1715 = vmatpush.bf16.msra.mxu1 %v1518_v1  ;;  %v1496_v12 = vld [vmem:[%s2170_s9 + $0x80] sm:$0xff]  ;;  %v1497_v15 = vld [vmem:[%s2170_s9 + $0x88] sm:$0xff]  ;;  %v1483_v16 = vld [vmem:[%s2170_s9 + $0x18] sm:$0xff]  ;;  %p1900_p1 = scmp.ne.s32.totalorder %s1898_s25, %s1899_s26  ;;  %p1905_p12 = scmp.lt.s32.totalorder %s1903_s30, %s1899_s26 }
  0x30   : > { %1716 = vmatpush.bf16.msra.mxu2 %v1518_v1  ;;  %1717 = vmatpush.bf16.msra.mxu3 %v1518_v1  ;;  %v1491_v17 = vld [vmem:[%s2170_s9 + $0x58] sm:$0xff]  ;;  %v1498_v18 = vld [vmem:[%s2170_s9 + $0x90] sm:$0xff]  ;;  %v1504_v19 = vld [vmem:[%s2170_s9 + $0xc0] sm:$0xff] }
  0x31   : > { %v1484_v20 = vld [vmem:[%s2170_s9 + $0x20] sm:$0xff]  ;;  %v1499_v22 = vld [vmem:[%s2170_s9 + $0x98] sm:$0xff]  ;;  %v1505_v23 = vld [vmem:[%s2170_s9 + $0xc8] sm:$0xff]  ;;  %p1901_p4 = pnand %p1900_p1, %p2141_p5  ;;  %p1906_p13 = por %p1905_p12, %p1904_p10 }
  0x32   : > { %v1492_v21 = vld [vmem:[%s2170_s9 + $0x60] sm:$0xff]  ;;  %v1485_v24 = vld [vmem:[%s2170_s9 + $0x28] sm:$0xff]  ;;  %v1506_v27 = vld [vmem:[%s2170_s9 + $0xd0] sm:$0xff] }
  0x33   : > { %600 = vmatpush.bf16.msra.mxu0 %v1517_v2  ;;  %1718 = vmatpush.bf16.msra.mxu1 %v1517_v2  ;;  %v1493_v25 = vld [vmem:[%s2170_s9 + $0x68] sm:$0xff]  ;;  %v1500_v26 = vld [vmem:[%s2170_s9 + $0xa0] sm:$0xff]  ;;  %v1486_v28 = vld [vmem:[%s2170_s9 + $0x30] sm:$0xff]  ;;  %p1902_p8 = pneg %p1901_p4 }
  0x34   : > { %1719 = vmatpush.bf16.msra.mxu2 %v1517_v2  ;;  %1720 = vmatpush.bf16.msra.mxu3 %v1517_v2  ;;  %v1494_v29 = vld [vmem:[%s2170_s9 + $0x70] sm:$0xff]  ;;  %v1501_v30 = vld [vmem:[%s2170_s9 + $0xa8] sm:$0xff]  ;;  %v1507_v31 = vld [vmem:[%s2170_s9 + $0xd8] sm:$0xff] }
  0x35   : > { %v1487_v32 = vld [vmem:[%s2170_s9 + $0x38] sm:$0xff]  ;;  %v1502_v34 = vld [vmem:[%s2170_s9 + $0xb0] sm:$0xff]  ;;  %v1508_v35 = vld [vmem:[%s2170_s9 + $0xe0] sm:$0xff]  ;;  %p1907_p0 = pnand %p1906_p13, %p1902_p8 }
  0x36   : > { %v1495_v33 = vld [vmem:[%s2170_s9 + $0x78] sm:$0xff]  ;;  %v1509_v39 = vld [vmem:[%s2170_s9 + $0xe8] sm:$0xff]  ;;  %v1510_v53 = vld [vmem:[%s2170_s9 + $0xf0] sm:$0xff] }
  0x37   : > { %601 = vmatpush.bf16.msra.mxu0 %v1516_v3  ;;  %1721 = vmatpush.bf16.msra.mxu1 %v1516_v3  ;;  %v1503_v38 = vld [vmem:[%s2170_s9 + $0xb8] sm:$0xff] }
  0x38   : > { %1722 = vmatpush.bf16.msra.mxu2 %v1516_v3  ;;  %1723 = vmatpush.bf16.msra.mxu3 %v1516_v3 }
  0x3b   : > { %602 = vmatpush.bf16.msra.mxu0 %v1515_v4  ;;  %1724 = vmatpush.bf16.msra.mxu1 %v1515_v4 }
  0x3c   : > { %1725 = vmatpush.bf16.msra.mxu2 %v1515_v4  ;;  %1726 = vmatpush.bf16.msra.mxu3 %v1515_v4 }
  0x3f   : > { %603 = vmatpush.bf16.msra.mxu0 %v1514_v5  ;;  %1727 = vmatpush.bf16.msra.mxu1 %v1514_v5 }
  0x40   : > { %1728 = vmatpush.bf16.msra.mxu2 %v1514_v5  ;;  %1729 = vmatpush.bf16.msra.mxu3 %v1514_v5  ;;  %v1511_v5 = vld [vmem:[%s2170_s9 + $0xf8] sm:$0xff] }
  0x43   : > { %604 = vmatpush.bf16.msra.mxu0 %v1513_v6  ;;  %1730 = vmatpush.bf16.msra.mxu1 %v1513_v6 }
  0x44   : > { %1731 = vmatpush.bf16.msra.mxu2 %v1513_v6  ;;  %1732 = vmatpush.bf16.msra.mxu3 %v1513_v6 }
  0x47   : > { %605 = vmatpush.bf16.msra.mxu0 %v1512_v7  ;;  %1733 = vmatpush.bf16.msra.mxu1 %v1512_v7 }
  0x48   : > { %1734 = vmatpush.bf16.msra.mxu2 %v1512_v7  ;;  %1735 = vmatpush.bf16.msra.mxu3 %v1512_v7 }
  0x4a   : > { %606 = vmatmul.bf16.vlgmr.msra.gmra.mxu0 %v1480_v8  ;;  %646 = vmatmul.bf16.vlgmr.msra.gmra.mxu1 %v1488_v9 }
  0x4b   : > { %686 = vmatmul.bf16.vlgmr.msra.gmra.mxu2 %v1496_v12  ;;  %726 = vmatmul.bf16.vlgmr.msra.gmra.mxu3 %v1504_v19 }
  0x5a   : > { %611 = vmatmul.bf16.gmra.mxu0 %v1481_v10  ;;  %651 = vmatmul.bf16.gmra.mxu1 %v1489_v11 }
  0x5b   : > { %691 = vmatmul.bf16.gmra.mxu2 %v1497_v15  ;;  %731 = vmatmul.bf16.gmra.mxu3 %v1505_v23 }
  0x6a   : > { %616 = vmatmul.bf16.gmra.mxu0 %v1482_v13  ;;  %656 = vmatmul.bf16.gmra.mxu1 %v1490_v14 }
  0x6b   : > { %696 = vmatmul.bf16.gmra.mxu2 %v1498_v18  ;;  %736 = vmatmul.bf16.gmra.mxu3 %v1506_v27 }
  0x7a   : > { %621 = vmatmul.bf16.gmra.mxu0 %v1483_v16  ;;  %661 = vmatmul.bf16.gmra.mxu1 %v1491_v17 }
  0x7b   : > { %701 = vmatmul.bf16.gmra.mxu2 %v1499_v22  ;;  %741 = vmatmul.bf16.gmra.mxu3 %v1507_v31 }
  0x8a   : > { %626 = vmatmul.bf16.gmra.mxu0 %v1484_v20  ;;  %666 = vmatmul.bf16.gmra.mxu1 %v1492_v21 }
  0x8b   : > { %706 = vmatmul.bf16.gmra.mxu2 %v1500_v26  ;;  %746 = vmatmul.bf16.gmra.mxu3 %v1508_v35 }
  0x9a   : > { %631 = vmatmul.bf16.gmra.mxu0 %v1485_v24  ;;  %671 = vmatmul.bf16.gmra.mxu1 %v1493_v25 }
  0x9b   : > { %711 = vmatmul.bf16.gmra.mxu2 %v1501_v30  ;;  %751 = vmatmul.bf16.gmra.mxu3 %v1509_v39 }
  0xaa   : > { %636 = vmatmul.bf16.gmra.mxu0 %v1486_v28  ;;  %676 = vmatmul.bf16.gmra.mxu1 %v1494_v29 }
  0xab   : > { %716 = vmatmul.bf16.gmra.mxu2 %v1502_v34  ;;  %756 = vmatmul.bf16.gmra.mxu3 %v1510_v53 }
  0xba   : > { %641 = vmatmul.bf16.gmra.mxu0 %v1487_v32  ;;  %681 = vmatmul.bf16.gmra.mxu1 %v1495_v33 }
  0xbb   : > { %721 = vmatmul.bf16.gmra.mxu2 %v1503_v38  ;;  %761 = vmatmul.bf16.gmra.mxu3 %v1511_v5 }
  0xc7   : > { %v607_v36 = vpop.f32.mrf.mxu0  ;;  %v2208_v37 = vpop.f32.mrf.mxu1 }
  0xc8   : > { %v965_v40 = vmul.f32 %v607_v36, %v607_v36 }
  0xce   : > { %v2229_v60 = vpop.f32.mrf.mxu2  ;;  %v2266_v20 = vpop.f32.mrf.mxu3 }
  0xcf   : > { %v609_v41 = vpop.f32.mrf.mxu0  ;;  %v2212_v42 = vpop.f32.mrf.mxu1 }
  0xd0   : > { %v1524_v43 = vpack.c.bf16 %v609_v41, %v607_v36  ;;  %v895_v44 = vadd.f32 %v609_v41, %v607_v36  ;;  %v966_v45 = vmul.f32 %v609_v41, %v609_v41  ;;  %v1564_v46 = vpack.c.bf16 %v2212_v42, %v2208_v37 }
  0xd2   : > { %1525 = vst [vmem:[%s2218_s1] sm:$0xff] %v1524_v43   ;;  %v1029_v47 = vadd.f32 %v966_v45, %v965_v40 }
  0xd3   : > { %1688 = vst [vmem:[%s2218_s1 + $0x40] sm:$0xff] %v1564_v46  }
  0xd6   : > { %v2237_v2 = vpop.f32.mrf.mxu2  ;;  %v2274_v24 = vpop.f32.mrf.mxu3 }
  0xd7   : > { %v612_v48 = vpop.f32.mrf.mxu0  ;;  %v2222_v49 = vpop.f32.mrf.mxu1  ;;  %v1604_v3 = vpack.c.bf16 %v2237_v2, %v2229_v60  ;;  %v1644_v26 = vpack.c.bf16 %v2274_v24, %v2266_v20 }
  0xd8   : > { %v896_v50 = vadd.f32 %v895_v44, %v612_v48  ;;  %v967_v51 = vmul.f32 %v612_v48, %v612_v48 }
  0xd9   : > { %1696 = vst [vmem:[%s2218_s1 + $0x80] sm:$0xff] %v1604_v3  }
  0xda   : > { %v1030_v52 = vadd.f32 %v1029_v47, %v967_v51  ;;  %1704 = vst [vmem:[%s2218_s1 + $0xc0] sm:$0xff] %v1644_v26  }
  0xde   : > { %v2249_v10 = vpop.f32.mrf.mxu2  ;;  %v2288_v32 = vpop.f32.mrf.mxu3 }
  0xdf   : > { %v614_v54 = vpop.f32.mrf.mxu0  ;;  %v2225_v55 = vpop.f32.mrf.mxu1 }
  0xe0   : > { %v1529_v56 = vpack.c.bf16 %v614_v54, %v612_v48  ;;  %v897_v57 = vadd.f32 %v896_v50, %v614_v54  ;;  %v968_v58 = vmul.f32 %v614_v54, %v614_v54  ;;  %v1569_v59 = vpack.c.bf16 %v2225_v55, %v2222_v49 }
  0xe2   : > { %1681 = vst [vmem:[%s2218_s1 + $0x8] sm:$0xff] %v1529_v56   ;;  %v1031_v61 = vadd.f32 %v1030_v52, %v968_v58 }
  0xe3   : > { %1689 = vst [vmem:[%s2218_s1 + $0x48] sm:$0xff] %v1569_v59  }
  0xe6   : > { %v2255_v13 = vpop.f32.mrf.mxu2  ;;  %v2296_v36 = vpop.f32.mrf.mxu3 }
  0xe7   : > { %v617_v62 = vpop.f32.mrf.mxu0  ;;  %v2233_v63 = vpop.f32.mrf.mxu1  ;;  %v1609_v14 = vpack.c.bf16 %v2255_v13, %v2249_v10  ;;  %v1649_v39 = vpack.c.bf16 %v2296_v36, %v2288_v32 }
  0xe8   : > { %v2235_v0 = vadd.f32 %v897_v57, %v617_v62  ;;  %v969_v1 = vmul.f32 %v617_v62, %v617_v62 }
  0xe9   : > { %1697 = vst [vmem:[%s2218_s1 + $0x88] sm:$0xff] %v1609_v14  }
  0xea   : > { %v2241_v4 = vadd.f32 %v1031_v61, %v969_v1  ;;  %1705 = vst [vmem:[%s2218_s1 + $0xc8] sm:$0xff] %v1649_v39  }
  0xee   : > { %v2264_v19 = vpop.f32.mrf.mxu2  ;;  %v2310_v46 = vpop.f32.mrf.mxu3 }
  0xef   : > { %v619_v6 = vpop.f32.mrf.mxu0  ;;  %v2245_v7 = vpop.f32.mrf.mxu1 }
  0xf0   : > { %v1534_v8 = vpack.c.bf16 %v619_v6, %v617_v62  ;;  %v1574_v9 = vpack.c.bf16 %v2245_v7, %v2233_v63  ;;  %v970_v52 = vmul.f32 %v619_v6, %v619_v6  ;;  %v899_v57 = vadd.f32 %v2235_v0, %v619_v6 }
  0xf2   : > { %1682 = vst [vmem:[%s2218_s1 + $0x10] sm:$0xff] %v1534_v8   ;;  %v1033_v58 = vadd.f32 %v2241_v4, %v970_v52 }
  0xf3   : > { %1690 = vst [vmem:[%s2218_s1 + $0x50] sm:$0xff] %v1574_v9  }
  0xf6   : > { %v2272_v23 = vpop.f32.mrf.mxu2  ;;  %v2318_v51 = vpop.f32.mrf.mxu3 }
  0xf7   : > { %v622_v11 = vpop.f32.mrf.mxu0  ;;  %v2253_v12 = vpop.f32.mrf.mxu1  ;;  %v1614_v25 = vpack.c.bf16 %v2272_v23, %v2264_v19  ;;  %v1654_v54 = vpack.c.bf16 %v2318_v51, %v2310_v46 }
  0xf8   : > { %v971_v56 = vmul.f32 %v622_v11, %v622_v11  ;;  %v900_v61 = vadd.f32 %v899_v57, %v622_v11 }
  0xf9   : > { %1698 = vst [vmem:[%s2218_s1 + $0x90] sm:$0xff] %v1614_v25  }
  0xfa   : > { %1706 = vst [vmem:[%s2218_s1 + $0xd0] sm:$0xff] %v1654_v54   ;;  %v1034_v62 = vadd.f32 %v1033_v58, %v971_v56 }
  0xfe   : > { %v2286_v31 = vpop.f32.mrf.mxu2  ;;  %v2334_v0 = vpop.f32.mrf.mxu3 }
  0xff   : > { %v624_v15 = vpop.f32.mrf.mxu0  ;;  %v2260_v16 = vpop.f32.mrf.mxu1 }
 0x100   : > { %v1539_v17 = vpack.c.bf16 %v624_v15, %v622_v11  ;;  %v1579_v18 = vpack.c.bf16 %v2260_v16, %v2253_v12  ;;  %v972_v59 = vmul.f32 %v624_v15, %v624_v15  ;;  %v901_v8 = vadd.f32 %v900_v61, %v624_v15 }
 0x102   : > { %1683 = vst [vmem:[%s2218_s1 + $0x18] sm:$0xff] %v1539_v17   ;;  %v1035_v6 = vadd.f32 %v1034_v62, %v972_v59 }
 0x103   : > { %1691 = vst [vmem:[%s2218_s1 + $0x58] sm:$0xff] %v1579_v18  }
 0x106   : > { %v2294_v35 = vpop.f32.mrf.mxu2  ;;  %v2342_v54 = vpop.f32.mrf.mxu3 }
 0x107   : > { %v627_v21 = vpop.f32.mrf.mxu0  ;;  %v2270_v22 = vpop.f32.mrf.mxu1  ;;  %v1619_v38 = vpack.c.bf16 %v2294_v35, %v2286_v31  ;;  %v1659_v57 = vpack.c.bf16 %v2342_v54, %v2334_v0 }
 0x108   : > { %v973_v1 = vmul.f32 %v627_v21, %v627_v21  ;;  %v902_v4 = vadd.f32 %v901_v8, %v627_v21 }
 0x109   : > { %1699 = vst [vmem:[%s2218_s1 + $0x98] sm:$0xff] %v1619_v38  }
 0x10a   : > { %v1036_v11 = vadd.f32 %v1035_v6, %v973_v1  ;;  %1707 = vst [vmem:[%s2218_s1 + $0xd8] sm:$0xff] %v1659_v57  }
 0x10e   : > { %v2308_v45 = vpop.f32.mrf.mxu2 }
 0x10f   : > { %v629_v27 = vpop.f32.mrf.mxu0  ;;  %v2282_v28 = vpop.f32.mrf.mxu1 }
 0x110   : > { %v1544_v29 = vpack.c.bf16 %v629_v27, %v627_v21  ;;  %v1584_v30 = vpack.c.bf16 %v2282_v28, %v2270_v22  ;;  %v974_v18 = vmul.f32 %v629_v27, %v629_v27  ;;  %v903_v26 = vadd.f32 %v902_v4, %v629_v27 }
 0x112   : > { %1684 = vst [vmem:[%s2218_s1 + $0x20] sm:$0xff] %v1544_v29   ;;  %v1037_v29 = vadd.f32 %v1036_v11, %v974_v18  ;;  %v2356_v11 = vpop.f32.mrf.mxu3 }
 0x113   : > { %1692 = vst [vmem:[%s2218_s1 + $0x60] sm:$0xff] %v1584_v30  }
 0x116   : > { %v2316_v50 = vpop.f32.mrf.mxu2 }
 0x117   : > { %v632_v33 = vpop.f32.mrf.mxu0  ;;  %v2292_v34 = vpop.f32.mrf.mxu1  ;;  %v1624_v53 = vpack.c.bf16 %v2316_v50, %v2308_v45 }
 0x118   : > { %v975_v25 = vmul.f32 %v632_v33, %v632_v33  ;;  %v904_v15 = vadd.f32 %v903_v26, %v632_v33 }
 0x119   : > { %1700 = vst [vmem:[%s2218_s1 + $0xa0] sm:$0xff] %v1624_v53  }
 0x11a   : > { %v1038_v38 = vadd.f32 %v1037_v29, %v975_v25  ;;  %v982_v29 = vmul.f32 %v2212_v42, %v2212_v42 }
 0x11e   : > { %v2332_v17 = vpop.f32.mrf.mxu2 }
 0x11f   : > { %v634_v40 = vpop.f32.mrf.mxu0  ;;  %v2304_v41 = vpop.f32.mrf.mxu1 }
 0x120   : > { %v1549_v43 = vpack.c.bf16 %v634_v40, %v632_v33  ;;  %v1589_v44 = vpack.c.bf16 %v2304_v41, %v2292_v34  ;;  %v976_v30 = vmul.f32 %v634_v40, %v634_v40  ;;  %v905_v52 = vadd.f32 %v904_v15, %v634_v40 }
 0x122   : > { %1685 = vst [vmem:[%s2218_s1 + $0x28] sm:$0xff] %v1549_v43   ;;  %v1039_v21 = vadd.f32 %v1038_v38, %v976_v30  ;;  %v983_v38 = vmul.f32 %v2222_v49, %v2222_v49 }
 0x123   : > { %1693 = vst [vmem:[%s2218_s1 + $0x68] sm:$0xff] %v1589_v44  }
 0x126   : > { %v2340_v53 = vpop.f32.mrf.mxu2 }
 0x127   : > { %v637_v47 = vpop.f32.mrf.mxu0  ;;  %v2314_v48 = vpop.f32.mrf.mxu1  ;;  %v1629_v27 = vpack.c.bf16 %v2340_v53, %v2332_v17 }
 0x128   : > { %v977_v39 = vmul.f32 %v637_v47, %v637_v47  ;;  %v906_v33 = vadd.f32 %v905_v52, %v637_v47  ;;  %v984_v52 = vmul.f32 %v2225_v55, %v2225_v55 }
 0x129   : > { %1701 = vst [vmem:[%s2218_s1 + $0xa8] sm:$0xff] %v1629_v27   ;;  %v2374_v27 = vpop.f32.mrf.mxu3 }
 0x12a   : > { %v1040_v58 = vadd.f32 %v1039_v21, %v977_v39  ;;  %v1664_v57 = vpack.c.bf16 %v2374_v27, %v2356_v11 }
 0x12c   : > { %1708 = vst [vmem:[%s2218_s1 + $0xe0] sm:$0xff] %v1664_v57  }
 0x12f   : > { %v639_v3 = vpop.f32.mrf.mxu0  ;;  %v2328_v5 = vpop.f32.mrf.mxu1 }
 0x130   : > { %v1554_v9 = vpack.c.bf16 %v639_v3, %v637_v47  ;;  %v1594_v14 = vpack.c.bf16 %v2328_v5, %v2314_v48  ;;  %v978_v56 = vmul.f32 %v639_v3, %v639_v3  ;;  %v907_v61 = vadd.f32 %v906_v33, %v639_v3  ;;  %v2354_v47 = vpop.f32.mrf.mxu2 }
 0x131   : > { %v981_v3 = vmul.f32 %v2208_v37, %v2208_v37  ;;  %v994_v57 = vmul.f32 %v2328_v5, %v2328_v5 }
 0x132   : > { %1686 = vst [vmem:[%s2218_s1 + $0x30] sm:$0xff] %v1554_v9   ;;  %v1041_v40 = vadd.f32 %v1040_v58, %v978_v56 }
 0x133   : > { %1694 = vst [vmem:[%s2218_s1 + $0x70] sm:$0xff] %v1594_v14  }
 0x137   : > { %v642_v43 = vpop.f32.mrf.mxu0  ;;  %v2338_v44 = vpop.f32.mrf.mxu1 }
 0x138   : > { %v979_v59 = vmul.f32 %v642_v43, %v642_v43  ;;  %v908_v62 = vadd.f32 %v907_v61, %v642_v43  ;;  %v2372_v56 = vpop.f32.mrf.mxu2 }
 0x13a   : > { %v1042_v1 = vadd.f32 %v1041_v40, %v979_v59  ;;  %v987_v40 = vmul.f32 %v2253_v12, %v2253_v12 }
 0x13f   : > { %v644_v8 = vpop.f32.mrf.mxu0  ;;  %v2350_v9 = vpop.f32.mrf.mxu1 }
 0x140   : > { %v1559_v14 = vpack.c.bf16 %v644_v8, %v642_v43  ;;  %v909_v6 = vadd.f32 %v908_v62, %v644_v8  ;;  %v980_v18 = vmul.f32 %v644_v8, %v644_v8  ;;  %v1599_v4 = vpack.c.bf16 %v2350_v9, %v2338_v44 }
 0x141   : > { %v988_v8 = vmul.f32 %v2260_v16, %v2260_v16 }
 0x142   : > { %1687 = vst [vmem:[%s2218_s1 + $0x38] sm:$0xff] %v1559_v14   ;;  %v910_v25 = vadd.f32 %v909_v6, %v2208_v37  ;;  %v1043_v26 = vadd.f32 %v1042_v1, %v980_v18  ;;  %v2394_v6 = vpop.f32.mrf.mxu2  ;;  %v2396_v18 = vpop.f32.mrf.mxu3 }
 0x143   : > { %1695 = vst [vmem:[%s2218_s1 + $0x78] sm:$0xff] %v1599_v4  }
 0x144   : > { %v911_v30 = vadd.f32 %v910_v25, %v2212_v42  ;;  %v1044_v15 = vadd.f32 %v1043_v26, %v981_v3  ;;  %v1634_v42 = vpack.c.bf16 %v2372_v56, %v2354_v47  ;;  %v990_v25 = vmul.f32 %v2282_v28, %v2282_v28 }
 0x146   : > { %v912_v39 = vadd.f32 %v911_v30, %v2222_v49  ;;  %v1045_v43 = vadd.f32 %v1044_v15, %v982_v29  ;;  %v985_v49 = vmul.f32 %v2233_v63, %v2233_v63  ;;  %1702 = vst [vmem:[%s2218_s1 + $0xb0] sm:$0xff] %v1634_v42   ;;  %v992_v15 = vmul.f32 %v2304_v41, %v2304_v41 }
 0x148   : > { %v913_v37 = vadd.f32 %v912_v39, %v2225_v55  ;;  %v1046_v21 = vadd.f32 %v1045_v43, %v983_v38  ;;  %v986_v55 = vmul.f32 %v2245_v7, %v2245_v7 }
 0x14a   : > { %v914_v33 = vadd.f32 %v913_v37, %v2233_v63  ;;  %v1047_v58 = vadd.f32 %v1046_v21, %v984_v52  ;;  %v2410_v39 = vpop.f32.mrf.mxu2  ;;  %v2412_v43 = vpop.f32.mrf.mxu3  ;;  %v993_v37 = vmul.f32 %v2314_v48, %v2314_v48 }
 0x14b   : > { %v1669_v52 = vpack.c.bf16 %v2412_v43, %v2396_v18 }
 0x14c   : > { %v915_v59 = vadd.f32 %v914_v33, %v2245_v7  ;;  %v1048_v61 = vadd.f32 %v1047_v58, %v985_v49  ;;  %v989_v7 = vmul.f32 %v2270_v22, %v2270_v22  ;;  %v995_v58 = vmul.f32 %v2338_v44, %v2338_v44 }
 0x14d   : > { %1709 = vst [vmem:[%s2218_s1 + $0xe8] sm:$0xff] %v1669_v52  }
 0x14e   : > { %v1049_v62 = vadd.f32 %v1048_v61, %v986_v55  ;;  %v916_v1 = vadd.f32 %v915_v59, %v2253_v12 }
 0x150   : > { %v917_v63 = vadd.f32 %v916_v1, %v2260_v16  ;;  %v1050_v14 = vadd.f32 %v1049_v62, %v987_v40  ;;  %v991_v16 = vmul.f32 %v2292_v34, %v2292_v34  ;;  %v997_v40 = vmul.f32 %v2229_v60, %v2229_v60 }
 0x151   : > { %v998_v1 = vmul.f32 %v2237_v2, %v2237_v2 }
 0x152   : > { %v918_v4 = vadd.f32 %v917_v63, %v2270_v22  ;;  %v1051_v3 = vadd.f32 %v1050_v14, %v988_v8  ;;  %v2432_v61 = vpop.f32.mrf.mxu3  ;;  %v999_v63 = vmul.f32 %v2249_v10, %v2249_v10 }
 0x154   : > { %v919_v12 = vadd.f32 %v918_v4, %v2282_v28  ;;  %v1052_v26 = vadd.f32 %v1051_v3, %v989_v7  ;;  %v1639_v28 = vpack.c.bf16 %v2410_v39, %v2394_v6  ;;  %v1000_v7 = vmul.f32 %v2255_v13, %v2255_v13 }
 0x156   : > { %v920_v29 = vadd.f32 %v919_v12, %v2292_v34  ;;  %v1053_v30 = vadd.f32 %v1052_v26, %v990_v25  ;;  %1703 = vst [vmem:[%s2218_s1 + $0xb8] sm:$0xff] %v1639_v28  }
 0x158   : > { %v921_v22 = vadd.f32 %v920_v29, %v2304_v41  ;;  %v1054_v38 = vadd.f32 %v1053_v30, %v991_v16 }
 0x15a   : > { %v922_v34 = vadd.f32 %v921_v22, %v2314_v48  ;;  %v1055_v21 = vadd.f32 %v1054_v38, %v992_v15  ;;  %v996_v48 = vmul.f32 %v2350_v9, %v2350_v9  ;;  %v2446_v3 = vpop.f32.mrf.mxu3  ;;  %v1004_v22 = vmul.f32 %v2294_v35, %v2294_v35 }
 0x15b   : > { %v1674_v25 = vpack.c.bf16 %v2446_v3, %v2432_v61 }
 0x15c   : > { %v1056_v42 = vadd.f32 %v1055_v21, %v993_v37  ;;  %v923_v41 = vadd.f32 %v922_v34, %v2328_v5 }
 0x15d   : > { %1710 = vst [vmem:[%s2218_s1 + $0xf0] sm:$0xff] %v1674_v25  }
 0x15e   : > { %v1057_v49 = vadd.f32 %v1056_v42, %v994_v57  ;;  %v924_v33 = vadd.f32 %v923_v41, %v2338_v44  ;;  %v1008_v57 = vmul.f32 %v2340_v53, %v2340_v53 }
 0x160   : > { %v1058_v55 = vadd.f32 %v1057_v49, %v995_v58  ;;  %v925_v59 = vadd.f32 %v924_v33, %v2350_v9 }
 0x162   : > { %v926_v5 = vadd.f32 %v925_v59, %v2229_v60  ;;  %v1059_v62 = vadd.f32 %v1058_v55, %v996_v48  ;;  %v2464_v28 = vpop.f32.mrf.mxu3  ;;  %v1009_v55 = vmul.f32 %v2354_v47, %v2354_v47  ;;  %v1010_v48 = vmul.f32 %v2372_v56, %v2372_v56 }
 0x164   : > { %v927_v44 = vadd.f32 %v926_v5, %v2237_v2  ;;  %v1060_v8 = vadd.f32 %v1059_v62, %v997_v40  ;;  %v1001_v2 = vmul.f32 %v2264_v19, %v2264_v19 }
 0x166   : > { %v928_v9 = vadd.f32 %v927_v44, %v2249_v10  ;;  %v1061_v14 = vadd.f32 %v1060_v8, %v998_v1  ;;  %v1002_v10 = vmul.f32 %v2272_v23, %v2272_v23 }
 0x168   : > { %v929_v60 = vadd.f32 %v928_v9, %v2255_v13  ;;  %v1062_v4 = vadd.f32 %v1061_v14, %v999_v63  ;;  %v1003_v13 = vmul.f32 %v2286_v31, %v2286_v31 }
 0x16a   : > { %v930_v12 = vadd.f32 %v929_v60, %v2264_v19  ;;  %v1063_v26 = vadd.f32 %v1062_v4, %v1000_v7  ;;  %v2482_v33 = vpop.f32.mrf.mxu3 }
 0x16c   : > { %v931_v16 = vadd.f32 %v930_v12, %v2272_v23  ;;  %v1064_v29 = vadd.f32 %v1063_v26, %v1001_v2  ;;  %v1005_v23 = vmul.f32 %v2308_v45, %v2308_v45 }
 0x16e   : > { %v1065_v30 = vadd.f32 %v1064_v29, %v1002_v10  ;;  %v932_v15 = vadd.f32 %v931_v16, %v2286_v31  ;;  %v1006_v31 = vmul.f32 %v2316_v50, %v2316_v50 }
 0x170   : > { %v933_v19 = vadd.f32 %v932_v15, %v2294_v35  ;;  %v1066_v38 = vadd.f32 %v1065_v30, %v1003_v13  ;;  %v1007_v35 = vmul.f32 %v2332_v17, %v2332_v17 }
 0x172   : > { %v934_v52 = vadd.f32 %v933_v19, %v2308_v45  ;;  %v1067_v34 = vadd.f32 %v1066_v38, %v1004_v22 }
 0x174   : > { %v935_v37 = vadd.f32 %v934_v52, %v2316_v50  ;;  %v1068_v21 = vadd.f32 %v1067_v34, %v1005_v23  ;;  %v1679_v50 = vpack.c.bf16 %v2482_v33, %v2464_v28 }
 0x176   : > { %v936_v42 = vadd.f32 %v935_v37, %v2332_v17  ;;  %v1069_v45 = vadd.f32 %v1068_v21, %v1006_v31  ;;  %1711 = vst [vmem:[%s2218_s1 + $0xf8] sm:$0xff] %v1679_v50  }
 0x178   : > { %v937_v41 = vadd.f32 %v936_v42, %v2340_v53  ;;  %v1070_v49 = vadd.f32 %v1069_v45, %v1007_v35 }
 0x17a   : > { %v1071_v58 = vadd.f32 %v1070_v49, %v1008_v57  ;;  %v938_v17 = vadd.f32 %v937_v41, %v2354_v47 }
 0x17c   : > { %v1072_v59 = vadd.f32 %v1071_v58, %v1009_v55  ;;  %v939_v53 = vadd.f32 %v938_v17, %v2372_v56 }
 0x17d   : > { %1910 = shalt.err (!%p1907_p0)
}
 0x17e   : > { %s2034_s9 = smov 64   ;;  %s2035_s1 = smov 4   ;;  %v1073_v47 = vadd.f32 %v1072_v59, %v1010_v48  ;;  %v940_v56 = vadd.f32 %v939_v53, %v2394_v6  ;;  %v1011_v40 = vmul.f32 %v2394_v6, %v2394_v6  ;;  %v1012_v1 = vmul.f32 %v2410_v39, %v2410_v39 }
 0x17f   : > { %1742 = dma.vmem_to_hbm [thread:$0]  (%p2141_p5), %s2484_s6, 4096, %s1124_s7, %s1100_s12, %s2034_s9, %s2034_s9, %s2035_s1   ;;  %v1013_v44 = vmul.f32 %v2266_v20, %v2266_v20  ;;  %v1014_v9 = vmul.f32 %v2274_v24, %v2274_v24  ;;  %v1015_v6 = vmul.f32 %v2288_v32, %v2288_v32  ;;  %v1024_v31 = vmul.f32 %v2412_v43, %v2412_v43 }
 0x180   : > { %v1074_v5 = vadd.f32 %v1073_v47, %v1011_v40  ;;  %v941_v62 = vadd.f32 %v940_v56, %v2410_v39  ;;  %v1016_v39 = vmul.f32 %v2296_v36, %v2296_v36  ;;  %v1025_v35 = vmul.f32 %v2432_v61, %v2432_v61  ;;  %s1136_s28 = scalar_lea.hbm %s2638_s3, %s2021_s18  ;;  %s1104_s5 = sand.u32 1, %s2092_s21  }
 0x181   : > { %s1150_s12 = scalar_lea.hbm %s2639_s4, %s2021_s18  ;;  %s269_s25 = scalar_lea.vmem [#allocation8], %s2164_s8 }
 0x182   : > { %v942_v8 = vadd.f32 %v941_v62, %v2266_v20  ;;  %v1075_v63 = vadd.f32 %v1074_v5, %v1012_v1  ;;  %v1017_v20 = vmul.f32 %v2310_v46, %v2310_v46  ;;  %s2571_s26 = sshll.u32 %s269_s25, 4  ;;  %s2573_s27 = sshll.u32 %s1136_s28, 4  ;;  %s1139_s26 = int_to_ptr.vmem [resolvable:$true] %s2571_s26  ;;  %s1141_s27 = int_to_ptr.hbm [resolvable:$true] %s2573_s27 }
 0x183   : > { %s275_s29 = scalar_lea.vmem [#allocation10], %s2164_s8  ;;  %s2578_s21 = sshll.u32 %s1150_s12, 4  ;;  %s1155_s21 = int_to_ptr.hbm [resolvable:$true] %s2578_s21 }
 0x184   : > { %v943_v14 = vadd.f32 %v942_v8, %v2274_v24  ;;  %v1076_v7 = vadd.f32 %v1075_v63, %v1013_v44  ;;  %v1018_v24 = vmul.f32 %v2318_v51, %v2318_v51  ;;  %s2576_s30 = sshll.u32 %s275_s29, 4  ;;  %s1105_s18 = scalar_lea.sflag [#allocation9], %s1104_s5  ;;  %s1153_s30 = int_to_ptr.vmem [resolvable:$true] %s2576_s30 }
 0x185   : > { %s1925_s11 = sshra.s32 %s1141_s27, 4  ;;  %s1931_s1 = scalar_lea.hbm %s2638_s3, 2  ;;  %s1926_s11 = int_to_ptr.hbm [resolvable:$true] %s1925_s11 }
 0x186   : > { %v944_v60 = vadd.f32 %v943_v14, %v2288_v32  ;;  %v1077_v4 = vadd.f32 %v1076_v7, %v1014_v9  ;;  %v1019_v32 = vmul.f32 %v2334_v0, %v2334_v0  ;;  %s1927_s13 = scalar_lea.hbm %s1926_s11, 1  ;;  %p1932_p2 = scmp.lt.s32.totalorder %s1926_s11, %s2638_s3 }
 0x187   : > { %p1928_p3 = scmp.ne.s32.totalorder %s1926_s11, %s1927_s13  ;;  %p1933_p1 = scmp.lt.s32.totalorder %s1931_s1, %s1927_s13 }
 0x188   : > { %v945_v25 = vadd.f32 %v944_v60, %v2296_v36  ;;  %v1078_v2 = vadd.f32 %v1077_v4, %v1015_v6  ;;  %v1020_v36 = vmul.f32 %v2342_v54, %v2342_v54 }
 0x189   : > { %p1929_p7 = pnand %p1928_p3, %p2141_p5  ;;  %p1934_p4 = por %p1933_p1, %p1932_p2 }
 0x18a   : > { %v946_v12 = vadd.f32 %v945_v25, %v2310_v46  ;;  %v1079_v26 = vadd.f32 %v1078_v2, %v1016_v39  ;;  %v1021_v46 = vmul.f32 %v2356_v11, %v2356_v11 }
 0x18b   : > { %p1930_p9 = pneg %p1929_p7 }
 0x18c   : > { %v947_v10 = vadd.f32 %v946_v12, %v2318_v51  ;;  %v1080_v16 = vadd.f32 %v1079_v26, %v1017_v20  ;;  %v1022_v51 = vmul.f32 %v2374_v27, %v2374_v27 }
 0x18d   : > { %p1935_p8 = pnand %p1934_p4, %p1930_p9 }
 0x18e   : > { %v1081_v29 = vadd.f32 %v1080_v16, %v1018_v24  ;;  %v948_v13 = vadd.f32 %v947_v10, %v2334_v0  ;;  %v1023_v0 = vmul.f32 %v2396_v18, %v2396_v18 }
 0x190   : > { %v949_v30 = vadd.f32 %v948_v13, %v2342_v54  ;;  %v1082_v15 = vadd.f32 %v1081_v29, %v1019_v32 }
 0x192   : > { %v950_v22 = vadd.f32 %v949_v30, %v2356_v11  ;;  %v1083_v19 = vadd.f32 %v1082_v15, %v1020_v36 }
 0x194   : > { %v951_v38 = vadd.f32 %v950_v22, %v2374_v27  ;;  %v1084_v23 = vadd.f32 %v1083_v19, %v1021_v46 }
 0x196   : > { %v952_v52 = vadd.f32 %v951_v38, %v2396_v18  ;;  %v1085_v34 = vadd.f32 %v1084_v23, %v1022_v51  ;;  %v1026_v18 = vmul.f32 %v2446_v3, %v2446_v3 }
 0x198   : > { %v953_v54 = vadd.f32 %v952_v52, %v2412_v43  ;;  %v1086_v37 = vadd.f32 %v1085_v34, %v1023_v0  ;;  %v1027_v43 = vmul.f32 %v2464_v28, %v2464_v28 }
 0x19a   : > { %v1087_v11 = vadd.f32 %v1086_v37, %v1024_v31  ;;  %v954_v21 = vadd.f32 %v953_v54, %v2432_v61  ;;  %v1028_v61 = vmul.f32 %v2482_v33, %v2482_v33 }
 0x19c   : > { %v1088_v27 = vadd.f32 %v1087_v11, %v1025_v35  ;;  %v955_v42 = vadd.f32 %v954_v21, %v2446_v3 }
 0x19e   : > { %v1089_v45 = vadd.f32 %v1088_v27, %v1026_v18  ;;  %v956_v41 = vadd.f32 %v955_v42, %v2464_v28 }
 0x1a0   : > { %v1090_v57 = vadd.f32 %v1089_v45, %v1027_v43  ;;  %v957_v49 = vadd.f32 %v956_v41, %v2482_v33 }
 0x1a2   : > { %v958_v50 = vrot.slane %v957_v49, 4  ;;  %v1091_v58 = vadd.f32 %v1090_v57, %v1028_v61 }
 0x1a4   : > { %v959_v17 = vadd.f32 %v958_v50, %v957_v49  ;;  %v1092_v55 = vrot.slane %v1091_v58, 4 }
 0x1a6   : > { %v960_v3 = vrot.slane %v959_v17, 2  ;;  %v1093_v59 = vadd.f32 %v1092_v55, %v1091_v58 }
 0x1a8   : > { %v961_v53 = vadd.f32 %v960_v3, %v959_v17  ;;  %v1094_v28 = vrot.slane %v1093_v59, 2 }
 0x1aa   : > { %v962_v33 = vrot.slane %v961_v53, 1  ;;  %v1095_v48 = vadd.f32 %v1094_v28, %v1093_v59 }
 0x1ac   : > { %v963_v47 = vadd.f32 %v962_v33, %v961_v53  ;;  %v1096_v56 = vrot.slane %v1095_v48, 1 }
 0x1ae   : > { %v1097_v40 = vadd.f32 %v1096_v56, %v1095_v48  ;;  %964 = vst [vmem:[%s269_s25] sm:$0x1] %v963_v47 }
 0x1af   : > { %1938 = shalt.err (!%p1935_p8)
}
 0x1b0   : > { %1743 = dma.vmem_to_hbm [thread:$0]  (%p2141_p5), %s1139_s26, 16, %s1141_s27, %s1105_s18   ;;  %1098 = vst [vmem:[%s275_s29] sm:$0x1] %v1097_v40 }
 0x1b1   : > { %s1953_s28 = sshra.s32 %s1155_s21, 4  ;;  %s1959_s12 = scalar_lea.hbm %s2639_s4, 2  ;;  %s1954_s28 = int_to_ptr.hbm [resolvable:$true] %s1953_s28 }
 0x1b2   : > { %s1955_s5 = scalar_lea.hbm %s1954_s28, 1  ;;  %p1960_p0 = scmp.lt.s32.totalorder %s1954_s28, %s2639_s4 }
 0x1b3   : > { %p1956_p10 = scmp.ne.s32.totalorder %s1954_s28, %s1955_s5  ;;  %p1961_p3 = scmp.lt.s32.totalorder %s1959_s12, %s1955_s5 }
 0x1b5   : > { %p1957_p12 = pnand %p1956_p10, %p2141_p5  ;;  %p1962_p7 = por %p1961_p3, %p1960_p0 }
 0x1b7   : > { %p1958_p13 = pneg %p1957_p12 }
 0x1b9   : > { %p1963_p9 = pnand %p1962_p7, %p1958_p13 }
 0x1bb   : > { %1966 = shalt.err (!%p1963_p9)
}
 0x1bc   : > { %1744 = dma.vmem_to_hbm [thread:$0]  (%p2141_p5), %s1153_s30, 16, %s1155_s21, %s1105_s18  }
 0x1bd PF: > { %s1166_s26 = sand.u32 1, %s2009_s15   ;;  %p1757_p2 = pnand %p1306_p11, %p2108_p6 }
 0x1be   : > { %s1167_s27 = scalar_lea.sflag [#allocation4], %s1166_s26 }
 0x1bf   : > { %p1758_p1 = pneg %p1757_p2 }
 0x1c1   : > { %2000 = dma.done.wait (%p1758_p1), %s1167_s27, 4096  }
 0x1c2   : > { %2002 = vsyncadd (%p1758_p1), %s1167_s27, 4294963200  ;;  %s2654_s29 = sadd.s32 4294967294, %s2029_s20  }
 0x1c3   : > { %s1176_s10 = sand.u32 1, %s2654_s29  }
 0x1c4   : > { %s1177_s13 = scalar_lea.sflag [#allocation9], %s1176_s10 }
 0x1c5   : > { %2004 = dma.done.wait (%p1758_p1), %s1177_s13, 32  }
 0x1c6   : > { %2006 = vsyncadd (%p1758_p1), %s1177_s13, 4294967264  ;;  %s25_s20 = sadd.s32 1, %s2029_s20   ;;  %s2655_s24 = sld [smem:[#allocation15_spill]] }
 0x1c7   : > { %p22_p5 = scmp.ge.s32.totalorder %s25_s20, 4   ;;  %s2656_s15 = smov %s2013_s16 }
 0x1c8   : > { %s2657_s16 = smov %s2017_s17  ;;  %s2658_s17 = smov %s2150_s14 }
 0x1c9   : > { %s2659_s18 = smov %s2025_s19  ;;  %24 = sbr.rel (!%p22_p5) target bundleno = 11 (0xb), region = 110 }
 0x1cc   : > { %s2660_s19 = smov %s2655_s24 }
 0x1ce   :  { %1191 = vsyncpa [#allocation3], 1 }
 0x1cf   :  { %1193 = vsyncpa [#allocation3 + $0x1], 1 }
 0x1d0   :  { %1194 = vsyncpa [#allocation6], 1 }
 0x1d1   :  { %1195 = vsyncpa [#allocation4], 1 }
 0x1d2   :  { %1197 = vsyncpa [#allocation4 + $0x1], 1 }
 0x1d3   :  { %1198 = vsyncpa [#allocation9], 1 }
 0x1d4   :  { %1200 = vsyncpa [#allocation9 + $0x1], 1 }

</bundles_post_ra>
